<compile_context>
chip_gen: v7x
topology: tpu7x:2x2x1
jax: 0.10.0
libtpu: 0.0.40
codegen_flags: <defaults>
</compile_context>

<pallas_src>
import numpy as np
import jax
import jax.numpy as jnp
from jax.experimental import pallas as pl
from jax.experimental.pallas import tpu as pltpu


class SimpleBVP:
    """y''(x) + y(x) = 0 on [0, pi/2], with y(0) = 0, y(pi/2) = 1."""

    def __init__(self):
        # bcs['a'] = (x_a, y_a), bcs['b'] = (x_b, y_b)
        self.bcs = {"a": (0.0, 0.0), "b": (float(np.pi) / 2.0, 1.0)}

    def eval_ode(self, x, y, y_x, y_xx):
        # Pure jnp elementwise residual — traced inside the Pallas kernel.
        # (Inside the kernel x/y/y_x/y_xx arrive lane-dense as (1, N).)
        return y_xx + y


class CustomLossPallas:
    """Pallas-TPU equivalent of CustomLoss(bvp, gamma, bar_approach)."""

    def __init__(self, bvp, gamma, bar_approach=False):
        self.bvp = bvp
        self.gamma = float(gamma)
        self.bar_approach = bool(bar_approach)
        # One jit covers the packing ops AND the pallas_call -> single dispatch.
        self._jitted = jax.jit(self._loss)

    # ------------------------------------------------------------------ #
    def _loss(self, x, params):
        w1, b1, w2, b2 = params          # (1,H), (1,H), (1,H), (1,1)
        N = x.shape[0]
        H = w1.shape[1]
        Hp = ((H + 7) // 8) * 8          # sublane-aligned hidden width (pad w/ 0)
        y_a = float(self.bvp.bcs["a"][1])
        y_b = float(self.bvp.bcs["b"][1])
        gamma = self.gamma
        bar_approach = self.bar_approach
        eval_ode = self.bvp.eval_ode
        f32 = jnp.float32

        # --- layout plumbing (fused under jit with the kernel) ------------
        x_row = jnp.reshape(x.astype(f32), (1, N))               # lane-dense x

        def col(v):                       # (1,H) -> (Hp,1), zero-padded rows
            c = jnp.reshape(v.astype(f32), (H, 1))
            if Hp != H:
                c = jnp.concatenate([c, jnp.zeros((Hp - H, 1), f32)], axis=0)
            return c

        def lanes(c):                     # (Hp,1) -> (Hp,N) pre-broadcast
            return jnp.broadcast_to(c, (Hp, N))

        # Single (8 + 5*Hp, N) slab == ONE input DMA.
        #   row 0      : x
        #   row 1      : b2 broadcast across lanes
        #   rows 2..7  : zero padding (keeps param blocks 8-row aligned)
        #   rows 8+    : five (Hp, N) pre-broadcast parameter blocks:
        #                w1, b1, w2, w1*w2, -2*w1^2*w2
        header = jnp.concatenate(
            [x_row,
             jnp.broadcast_to(b2.astype(f32).reshape(1, 1), (1, N)),
             jnp.zeros((6, N), f32)],
            axis=0)                                               # (8, N)
        slab = jnp.concatenate(
            [header,
             lanes(col(w1)),
             lanes(col(b1)),
             lanes(col(w2)),
             lanes(col(w1 * w2)),
             lanes(col(-2.0 * w1 * w1 * w2))],
            axis=0)                                               # (8+5*Hp, N)

        def kernel(s_ref, out_ref):
            xr = s_ref[0:1, :]            # (1, N)  collocation points
            b2r = s_ref[1:2, :]           # (1, N)  b2 (lane-broadcast)
            o = 8
            w1b = s_ref[o:o + Hp, :]                 # (Hp, N)
            b1b = s_ref[o + Hp:o + 2 * Hp, :]
            w2b = s_ref[o + 2 * Hp:o + 3 * Hp, :]
            w1w2b = s_ref[o + 3 * Hp:o + 4 * Hp, :]
            m2b = s_ref[o + 4 * Hp:o + 5 * Hp, :]    # -2*w1^2*w2

            # MLP forward + analytic 1st/2nd derivatives w.r.t. scalar x.
            z = w1b * xr + b1b            # (Hp, N); xr sublane-broadcasts
            a = jnp.tanh(z)               # EUP
            s = 1.0 - a * a               # sech^2(z)

            # Cross-sublane reductions -> lane-dense (1, N) vectors.
            # (Padded rows contribute exactly 0; unused reductions are DCE'd.)
            y = jnp.sum(a * w2b, axis=0, keepdims=True) + b2r
            y_x = jnp.sum(s * w1w2b, axis=0, keepdims=True)
            y_xx = jnp.sum(a * s * m2b, axis=0, keepdims=True)

            res = eval_ode(xr, y, y_x, y_xx)                      # (1, N)
            ode_loss = jnp.mean(res * res)                        # scalar

            if bar_approach:
                total = ode_loss
            else:
                # Static boundary reads: y[0] is lane 0; roll(1) brings y[N-1]
                # to lane 0 (cheap XLU). Valid because there is no grid over N.
                y0 = jnp.sum(y[:, 0:1])
                yN = jnp.sum(pltpu.roll(y, shift=1, axis=1)[:, 0:1])
                bc_loss = gamma * ((y0 - y_a) ** 2 + (yN - y_b) ** 2)
                total = ode_loss + bc_loss

            out_ref[0, 0] = total

        out = pl.pallas_call(
            kernel,
            out_shape=jax.ShapeDtypeStruct((1, 1), jnp.float32),
            in_specs=[pl.BlockSpec(memory_space=pltpu.MemorySpace.VMEM)],
            out_specs=pl.BlockSpec(memory_space=pltpu.MemorySpace.SMEM),
        )(slab)

        if bar_approach:
            return out[0, 0]              # scalar, like torch.mean(...)
        return out[0]                     # shape (1,), like torch y[0]-indexed sum

    # ------------------------------------------------------------------ #
    def __call__(self, x, params):
        return self._jitted(x, params)


def ref_loss(x, params, bvp, gamma, bar_approach):
    """Pure-JAX reference using jax.grad twice (mirrors torch.autograd.grad)."""
    w1, b1, w2, b2 = params

    def f(xs):  # scalar -> scalar
        return jnp.sum(jnp.tanh(xs * w1[0] + b1[0]) * w2[0]) + b2[0, 0]

    xs = x[:, 0]
    y = jax.vmap(f)(xs)[:, None]
    y_x = jax.vmap(jax.grad(f))(xs)[:, None]
    y_xx = jax.vmap(jax.grad(jax.grad(f)))(xs)[:, None]
    res = bvp.eval_ode(x, y, y_x, y_xx)
    ode = jnp.mean(res ** 2)
    if bar_approach:
        return ode
    y_a, y_b = bvp.bcs["a"][1], bvp.bcs["b"][1]
    bc = gamma * ((y[0, 0] - y_a) ** 2 + (y[-1, 0] - y_b) ** 2)
    return jnp.reshape(ode + bc, (1,))


if __name__ == "__main__":
    N, H = 128, 32  # collocation points, hidden width
    bvp = SimpleBVP()
    gamma = 10.0

    # Collocation points: x[0] = a, x[-1] = b (the BC terms index y[0], y[-1]).
    x_a, x_b = bvp.bcs["a"][0], bvp.bcs["b"][0]
    x = jnp.linspace(x_a, x_b, N, dtype=jnp.float32)[:, None]   # (N, 1)

    # Deterministic MLP parameters (synthetic "network that produced y").
    k1, k2, k3, k4 = jax.random.split(jax.random.PRNGKey(0), 4)
    w1 = jax.random.normal(k1, (1, H), dtype=jnp.float32) * 0.5
    b1 = jax.random.normal(k2, (1, H), dtype=jnp.float32) * 0.1
    w2 = jax.random.normal(k3, (1, H), dtype=jnp.float32) * 0.5
    b2 = jax.random.normal(k4, (1, 1), dtype=jnp.float32) * 0.1
    params = (w1, b1, w2, b2)

    # bar_approach=False (ODE loss + BC penalty)
    loss_fn = CustomLossPallas(bvp, gamma, bar_approach=False)
    out = jax.block_until_ready(loss_fn(x, params))
    ref = jax.block_until_ready(ref_loss(x, params, bvp, gamma, bar_approach=False))
    assert out.shape == (1,)
    assert np.allclose(np.asarray(out), np.asarray(ref), rtol=1e-4, atol=1e-5), (out, ref)

    # bar_approach=True (ODE loss only)
    loss_fn_bar = CustomLossPallas(bvp, gamma, bar_approach=True)
    out_bar = jax.block_until_ready(loss_fn_bar(x, params))
    ref_bar = jax.block_until_ready(ref_loss(x, params, bvp, gamma, bar_approach=True))
    assert np.allclose(np.asarray(out_bar), np.asarray(ref_bar), rtol=1e-4, atol=1e-5), (
        out_bar, ref_bar)

    print("KERNEL_OK")
</pallas_src>

<mosaic_0001>
module attributes {stable_mosaic.version = 11 : i64} {
  func.func @kernel(%arg0: memref<168x128xf32, #tpu.memory_space<vmem>>, %arg1: memref<1x1xf32, #tpu.memory_space<smem>>) attributes {dimension_semantics = [], scalar_prefetch = 0 : i64, scratch_operands = 0 : i64, tpu.core_type = #tpu.core_type<tc>} {
    %c0 = arith.constant 0 : index
    %c0_0 = arith.constant 0 : index
    %0 = vector.load %arg0[%c0, %c0_0] : memref<168x128xf32, #tpu.memory_space<vmem>>, vector<1x128xf32>
    %c1 = arith.constant 1 : index
    %c0_1 = arith.constant 0 : index
    %1 = vector.load %arg0[%c1, %c0_1] : memref<168x128xf32, #tpu.memory_space<vmem>>, vector<1x128xf32>
    %c8 = arith.constant 8 : index
    %c0_2 = arith.constant 0 : index
    %2 = vector.load %arg0[%c8, %c0_2] : memref<168x128xf32, #tpu.memory_space<vmem>>, vector<32x128xf32>
    %c40 = arith.constant 40 : index
    %c0_3 = arith.constant 0 : index
    %3 = vector.load %arg0[%c40, %c0_3] : memref<168x128xf32, #tpu.memory_space<vmem>>, vector<32x128xf32>
    %c72 = arith.constant 72 : index
    %c0_4 = arith.constant 0 : index
    %4 = vector.load %arg0[%c72, %c0_4] : memref<168x128xf32, #tpu.memory_space<vmem>>, vector<32x128xf32>
    %c136 = arith.constant 136 : index
    %c0_5 = arith.constant 0 : index
    %5 = vector.load %arg0[%c136, %c0_5] : memref<168x128xf32, #tpu.memory_space<vmem>>, vector<32x128xf32>
    %6 = vector.broadcast %0 : vector<1x128xf32> to vector<32x128xf32>
    %7 = arith.mulf %2, %6 : vector<32x128xf32>
    %8 = arith.addf %7, %3 : vector<32x128xf32>
    %9 = math.tanh %8 : vector<32x128xf32>
    %10 = arith.mulf %9, %9 : vector<32x128xf32>
    %cst = arith.constant 1.000000e+00 : f32
    %11 = vector.broadcast %cst : f32 to vector<32x128xf32>
    %12 = arith.subf %11, %10 : vector<32x128xf32>
    %13 = arith.mulf %9, %4 : vector<32x128xf32>
    %cst_6 = arith.constant dense<0.000000e+00> : vector<128xf32>
    %14 = vector.multi_reduction <add>, %13, %cst_6 [0] : vector<32x128xf32> to vector<128xf32>
    %15 = vector.shape_cast %14 : vector<128xf32> to vector<1x128xf32>
    %16 = arith.addf %15, %1 : vector<1x128xf32>
    %17 = arith.mulf %9, %12 : vector<32x128xf32>
    %18 = arith.mulf %17, %5 : vector<32x128xf32>
    %cst_7 = arith.constant dense<0.000000e+00> : vector<128xf32>
    %19 = vector.multi_reduction <add>, %18, %cst_7 [0] : vector<32x128xf32> to vector<128xf32>
    %20 = vector.shape_cast %19 : vector<128xf32> to vector<1x128xf32>
    %21 = arith.addf %20, %16 : vector<1x128xf32>
    %22 = arith.mulf %21, %21 : vector<1x128xf32>
    %23 = vector.shape_cast %22 : vector<1x128xf32> to vector<1x1x128xf32>
    %cst_8 = arith.constant dense<0.000000e+00> : vector<1xf32>
    %24 = vector.multi_reduction <add>, %23, %cst_8 [1, 2] : vector<1x1x128xf32> to vector<1xf32>
    %25 = vector.shape_cast %24 : vector<1xf32> to vector<1x1x1xf32>
    %26 = vector.extract %25[0, 0, 0] : f32 from vector<1x1x1xf32>
    %cst_9 = arith.constant 1.280000e+02 : f32
    %27 = arith.divf %26, %cst_9 : f32
    %28 = vector.extract_strided_slice %16 {offsets = [0, 0], sizes = [1, 1], strides = [1, 1]} : vector<1x128xf32> to vector<1x1xf32>
    %29 = vector.shape_cast %28 : vector<1x1xf32> to vector<1x1x1xf32>
    %cst_10 = arith.constant dense<0.000000e+00> : vector<1xf32>
    %30 = vector.multi_reduction <add>, %29, %cst_10 [1, 2] : vector<1x1x1xf32> to vector<1xf32>
    %31 = vector.shape_cast %30 : vector<1xf32> to vector<1x1x1xf32>
    %32 = vector.extract %31[0, 0, 0] : f32 from vector<1x1x1xf32>
    %c1_i32 = arith.constant 1 : i32
    %33 = tpu.dynamic_rotate %16 by %c1_i32 dim 1 : vector<1x128xf32>, i32 -> vector<1x128xf32>
    %34 = vector.extract_strided_slice %33 {offsets = [0, 0], sizes = [1, 1], strides = [1, 1]} : vector<1x128xf32> to vector<1x1xf32>
    %35 = vector.shape_cast %34 : vector<1x1xf32> to vector<1x1x1xf32>
    %cst_11 = arith.constant dense<0.000000e+00> : vector<1xf32>
    %36 = vector.multi_reduction <add>, %35, %cst_11 [1, 2] : vector<1x1x1xf32> to vector<1xf32>
    %37 = vector.shape_cast %36 : vector<1xf32> to vector<1x1x1xf32>
    %38 = vector.extract %37[0, 0, 0] : f32 from vector<1x1x1xf32>
    %cst_12 = arith.constant 0.000000e+00 : f32
    %39 = arith.subf %32, %cst_12 : f32
    %40 = arith.mulf %39, %39 : f32
    %cst_13 = arith.constant 1.000000e+00 : f32
    %41 = arith.subf %38, %cst_13 : f32
    %42 = arith.mulf %41, %41 : f32
    %43 = arith.addf %40, %42 : f32
    %cst_14 = arith.constant 1.000000e+01 : f32
    %44 = arith.mulf %cst_14, %43 : f32
    %45 = arith.addf %27, %44 : f32
    %c0_15 = arith.constant 0 : index
    %c0_16 = arith.constant 0 : index
    %46 = memref.load %arg1[%c0_15, %c0_16] : memref<1x1xf32, #tpu.memory_space<smem>>
    memref.store %45, %arg1[%c0_15, %c0_16] : memref<1x1xf32, #tpu.memory_space<smem>>
    return
  }
}

</mosaic_0001>

<bundles_post_ra>
// kernel: _loss.1
= control target key start
LH: loop header
LB: loop body
LE: loop exit
PB: predicated region body
PF: predicated region fallthrough
CT: control target
= control target key end

     0   :  { %s233_s0 = inlined_call_operand.vmem [shape: f32[168,128], index: 0, kind: input, shape index: {}]   ;;  %s234_s1 = inlined_call_operand.hbm [shape: f32[1,1], index: 1, kind: output, shape index: {}]  }
   0x1   :  { %v125_v0 = vld [vmem:[%s233_s0] ss:$0 sm:$0xff]  ;;  %v11_v1 = vld [vmem:[%s233_s0 + $0x8] sm:$0xff]  ;;  %v12_v2 = vld [vmem:[%s233_s0 + $0x10] sm:$0xff] }
   0x2   :  { %v13_v3 = vld [vmem:[%s233_s0 + $0x18] sm:$0xff]  ;;  %v14_v4 = vld [vmem:[%s233_s0 + $0x20] sm:$0xff]  ;;  %v31_v5 = vmul.f32 %v125_v0, %v11_v1  ;;  %v15_v6 = vld [vmem:[%s233_s0 + $0x28] sm:$0xff]  ;;  %v32_v9 = vmul.f32 %v125_v0, %v12_v2 }
   0x3   :  { %v16_v7 = vld [vmem:[%s233_s0 + $0x30] sm:$0xff]  ;;  %v17_v8 = vld [vmem:[%s233_s0 + $0x38] sm:$0xff]  ;;  %v33_v10 = vmul.f32 %v125_v0, %v13_v3  ;;  %v34_v11 = vmul.f32 %v125_v0, %v14_v4  ;;  %v18_v12 = vld [vmem:[%s233_s0 + $0x40] sm:$0xff] }
   0x4   :  { %v35_v13 = vadd.f32 %v31_v5, %v15_v6  ;;  %v36_v14 = vadd.f32 %v32_v9, %v16_v7 }
   0x5   :  { %v37_v15 = vadd.f32 %v33_v10, %v17_v8  ;;  %v38_v16 = vadd.f32 %v34_v11, %v18_v12 }
   0x6   :  { %135 = vtanh.f32 %v35_v13 }
   0x7   :  { %137 = vtanh.f32 %v36_v14 }
   0x8   :  { %6 = vsyncpa [#allocation3], 0  ;;  %139 = vtanh.f32 %v37_v15  ;;  %v19_v17 = vld [vmem:[%s233_s0 + $0x48] sm:$0xff]  ;;  %v20_v18 = vld [vmem:[%s233_s0 + $0x50] sm:$0xff]  ;;  %vm84_vm0 = vcmask 1040384   ;;  %s155_s13 = smov 1  }
   0x9   :  { %141 = vtanh.f32 %v38_v16  ;;  %v21_v20 = vld [vmem:[%s233_s0 + $0x58] sm:$0xff]  ;;  %v22_v22 = vld [vmem:[%s233_s0 + $0x60] sm:$0xff]  ;;  %v23_v32 = vld [vmem:[%s233_s0 + $0x88] sm:$0xff]  ;;  %s143_s25 = scalar_lea.hbm %s234_s1, 16 }
   0xa   :  { %v24_v37 = vld [vmem:[%s233_s0 + $0x90] sm:$0xff]  ;;  %v25_v40 = vld [vmem:[%s233_s0 + $0x98] sm:$0xff]  ;;  %v26_v44 = vld [vmem:[%s233_s0 + $0xa0] sm:$0xff]  ;;  %p144_p0 = scmp.ne.s32.totalorder %s234_s1, %s143_s25  ;;  %p147_p1 = scmp.lt.u32.totalorder %s143_s25, %s234_s1 }
   0xb   :  { %v10_v0 = vld [vmem:[%s233_s0 + $0x1] sm:$0x1] }
   0xc   :  { %p149_p2 = pnand %p147_p1, %p144_p0 }
  0x10   :  { %v136_v19 = vpop.eup %135 }
  0x11   :  { %v138_v21 = vpop.eup %137  ;;  %v43_v23 = vmul.f32 %v136_v19, %v136_v19  ;;  %v51_v24 = vmul.f32 %v136_v19, %v19_v17 }
  0x12   :  { %v140_v25 = vpop.eup %139  ;;  %v44_v26 = vmul.f32 %v138_v21, %v138_v21  ;;  %v52_v27 = vmul.f32 %v138_v21, %v20_v18 }
  0x13   :  { %v142_v28 = vpop.eup %141  ;;  %v45_v29 = vmul.f32 %v140_v25, %v140_v25  ;;  %v47_v30 = vsub.f32 1.0, %v43_v23  ;;  %v53_v31 = vmul.f32 %v140_v25, %v21_v20 }
  0x14   :  { %v46_v33 = vmul.f32 %v142_v28, %v142_v28  ;;  %v48_v34 = vsub.f32 1.0, %v44_v26  ;;  %v54_v35 = vmul.f32 %v142_v28, %v22_v22  ;;  %v55_v36 = vadd.f32 %v52_v27, %v51_v24 }
  0x15   :  { %v49_v38 = vsub.f32 1.0, %v45_v29  ;;  %v65_v39 = vmul.f32 %v136_v19, %v47_v30 }
  0x16   :  { %v50_v41 = vsub.f32 1.0, %v46_v33  ;;  %v56_v42 = vadd.f32 %v55_v36, %v53_v31  ;;  %v66_v43 = vmul.f32 %v138_v21, %v48_v34 }
  0x17   :  { %v67_v45 = vmul.f32 %v140_v25, %v49_v38  ;;  %v69_v46 = vmul.f32 %v65_v39, %v23_v32 }
  0x18   :  { %v57_v47 = vadd.f32 %v56_v42, %v54_v35  ;;  %v68_v48 = vmul.f32 %v142_v28, %v50_v41  ;;  %v70_v49 = vmul.f32 %v66_v43, %v24_v37 }
  0x19   :  { %v71_v50 = vmul.f32 %v67_v45, %v25_v40 }
  0x1a   :  { %v58_v51 = vrot.slane %v57_v47, 4  ;;  %v72_v52 = vmul.f32 %v68_v48, %v26_v44  ;;  %v73_v53 = vadd.f32 %v70_v49, %v69_v46 }
  0x1c   :  { %v59_v54 = vadd.f32 %v58_v51, %v57_v47  ;;  %v74_v55 = vadd.f32 %v73_v53, %v71_v50 }
  0x1e   :  { %v60_v56 = vrot.slane %v59_v54, 2  ;;  %v75_v57 = vadd.f32 %v74_v55, %v72_v52 }
  0x20   :  { %v61_v58 = vadd.f32 %v60_v56, %v59_v54  ;;  %v76_v59 = vrot.slane %v75_v57, 4 }
  0x22   :  { %v62_v60 = vrot.slane %v61_v58, 1  ;;  %v77_v61 = vadd.f32 %v76_v59, %v75_v57 }
  0x24   :  { %v63_v62 = vadd.f32 %v62_v60, %v61_v58  ;;  %v78_v63 = vrot.slane %v77_v61, 2 }
  0x26   :  { %v79_v1 = vadd.f32 %v78_v63, %v77_v61  ;;  %v64_v2 = vadd.f32 %v63_v62, %v10_v0 }
  0x28   :  { %v80_v3 = vrot.slane %v79_v1, 1 }
  0x2a   :  { %v81_v4 = vadd.f32 %v80_v3, %v79_v1 }
  0x2c   :  { %v82_v5 = vadd.f32 %v81_v4, %v64_v2 }
  0x2e   :  { %v83_v6 = vmul.f32 %v82_v5, %v82_v5 }
  0x30   :  { %v85_v7 = vsel %vm84_vm0, %v83_v6, 0.0 }
  0x31   :  { %86 = vadd.xlane.f32.xlu0 %v85_v7 }
  0x47   :  { %100 = vrot.lane.b32.xlu0 %v64_v2, %s155_s13 }
  0xbe   :  { %v87_v8 = vpop.xlane.xlu0 %86 }
  0xbf   :  { %v88_v9 = vrot.slane %v87_v8, 4 }
  0xc1   :  { %v89_v10 = vadd.f32 %v88_v9, %v87_v8 }
  0xc2   :  { %v101_v15 = vpop.permute.xlu0 %100 }
  0xc3   :  { %v90_v11 = vrot.slane %v89_v10, 2 }
  0xc5   :  { %v91_v12 = vadd.f32 %v90_v11, %v89_v10 }
  0xc7   :  { %v92_v13 = vrot.slane %v91_v12, 1 }
  0xc9   :  { %v93_v14 = vadd.f32 %v92_v13, %v91_v12 }
  0xcb   :  { %127 = vpush %v93_v14 }
  0xcc   :  { %129 = vpush %v64_v2 }
  0xcd   :  { %131 = vpush %v101_v15 }
  0xfc   :  { %s128_s0 = spop %127 }
  0xfd   :  { %s130_s14 = spop %129  ;;  %s97_s20 = smul.f32 0.0078125, %s128_s0 }
  0xfe   :  { %s132_s15 = spop %131  ;;  %s104_s17 = smul.f32 %s130_s14, %s130_s14 }
  0xff   :  { %s126_s16 = sadd.f32 -1.0, %s132_s15 }
 0x101   :  { %s106_s18 = smul.f32 %s126_s16, %s126_s16 }
 0x103   :  { %s107_s19 = sadd.f32 %s106_s18, %s104_s17 }
 0x105   :  { %s108_s21 = smul.f32 10.0, %s107_s19 }
 0x107   :  { %s109_s22 = sadd.f32 %s108_s21, %s97_s20 }
 0x109   :  { %111 = sst [smem:[#allocation2]] %s109_s22 }
 0x10a   :  { %152 = shalt.err (!%p149_p2)
}
 0x10b   :  { %s156_s30 = smov [#allocation2]  }
 0x10c   :  { %119 = dma.smem_to_hbm %s156_s30, 16, %s234_s1, [#allocation3]  }
 0x10d   :  { %153 = dma.done.wait [#allocation3], 16  }
 0x10e   :  { %154 = vsyncadd [#allocation3], 4294967280 }
 0x10f   :  { %123 = sfence }
 0x110   :  { %124 = vsyncpa [#allocation3], 1 }

</bundles_post_ra>
